<compile_context>
chip_gen: v7x
topology: tpu7x:2x2x1
jax: 0.10.0
libtpu: 0.0.40
codegen_flags: <defaults>
</compile_context>

<pallas_src>
import functools

import jax
import jax.numpy as jnp
from jax.experimental import pallas as pl
from jax.experimental.pallas import tpu as pltpu


def _round_up(x: int, m: int) -> int:
    return (x + m - 1) // m * m


def _vmem_budget_bytes() -> int:
    """Explicit scoped-VMEM budget: ~80% of physical, clamped to a safe range."""
    cap = 64 * 1024 * 1024
    try:
        cap = int(pltpu.get_tpu_info().vmem_capacity_bytes)
    except Exception:
        pass
    return max(min(cap * 4 // 5, 112 * 1024 * 1024), 32 * 1024 * 1024)


def _pick_tile(n: int, kd: int, lp: int, x_bytes: int, c_bytes: int,
               o_bytes: int, budget: int) -> int:
    """Row-tile size so (weights + double-buffered streaming tiles) fits the VMEM budget."""
    # Worst case: weight blocks double-buffered even though their block index is constant.
    resident = 2 * (kd * lp + lp * lp) * c_bytes + 8 * lp * 4
    per_row_p1 = 2 * (kd * x_bytes + lp * c_bytes)      # pass 1: x in + h out
    per_row_p2 = 2 * (lp * c_bytes + lp * o_bytes)      # pass 2: h in + y out
    per_row = max(per_row_p1, per_row_p2)
    avail = max(budget - resident, 2 * 1024 * 1024)
    tile = max(int(avail // per_row), 8)
    tile = min(tile, 1024, _round_up(n, 8))
    return max(tile // 8 * 8, 8)


# --------------------------------------------------------------------------- pass 1
def _stats_kernel(x_ref, w1_ref, h_ref, sum_ref, sq_ref, *, n_valid: int, tile_n: int):
    i = pl.program_id(0)

    @pl.when(i == 0)
    def _():
        sum_ref[...] = jnp.zeros_like(sum_ref)
        sq_ref[...] = jnp.zeros_like(sq_ref)

    # Linear1 WITHOUT bias: under train-mode BatchNorm the bias is part of the batch
    # mean and cancels exactly, so it never needs to enter the compute.
    # Cast to the weight dtype (bf16 by default) in-kernel -> native MXU operands,
    # f32 accumulation.
    h = jnp.dot(x_ref[...].astype(w1_ref.dtype), w1_ref[...],
                preferred_element_type=jnp.float32)

    # Cache pre-BN activations for pass 2. The last partial block's writeback is masked
    # by Pallas, so garbage rows never land in the (N, Lpad) HBM array.
    h_ref[...] = h.astype(h_ref.dtype)

    # Mask rows beyond the true row count so the padded rows of the last partial tile
    # (stale / possibly-NaN VMEM content) don't contaminate the batch statistics.
    row = i * tile_n + jax.lax.broadcasted_iota(jnp.int32, (tile_n, 1), 0)
    hm = jnp.where(row < n_valid, h, 0.0)
    sum_ref[...] += jnp.sum(hm, axis=0, keepdims=True)
    sq_ref[...] += jnp.sum(hm * hm, axis=0, keepdims=True)


# --------------------------------------------------------------------------- pass 2
def _apply_kernel(h_ref, scale_ref, shift_ref, w2_ref, b2_ref, o_ref):
    # Folded BatchNorm affine in f32: scale = gamma*rsqrt(var+eps), shift = beta - mean*scale
    h = h_ref[...].astype(jnp.float32) * scale_ref[...] + shift_ref[...]
    # Exact erf-based GELU (matches nn.GELU() default).
    h = 0.5 * h * (1.0 + jax.lax.erf(h * jnp.float32(0.7071067811865476)))
    # Linear2 on the MXU (bf16 operands by default, f32 accumulation).
    y = jnp.dot(h.astype(w2_ref.dtype), w2_ref[...],
                preferred_element_type=jnp.float32) + b2_ref[...]
    o_ref[...] = y.astype(o_ref.dtype)


# --------------------------------------------------------------------------- wrappers
def prepare_params(params, *, compute_dtype=jnp.bfloat16):
    """One-time weight prep, hoisted out of the forward path:
         * transpose PyTorch (out, in) weights to (in, out),
         * pad the latent (output-lane) dim to a multiple of 128 (lane-dense MXU columns),
         * keep the K (vision) dim at its native extent (full-dim BlockSpec exemption, so
           x never needs a wrapper-side pad pass),
         * cast matmul weights to compute_dtype (bf16 default -> native MXU format).
       linear1's bias is intentionally not prepared: under train-mode BatchNorm it cancels
       exactly and has no effect on the forward output."""
    w1 = jnp.asarray(params["w1"])                 # (latent, vision)  torch layout
    w2 = jnp.asarray(params["w2"])                 # (latent, latent)
    latent_dim, vision_dim = w1.shape
    lp = _round_up(latent_dim, 128)
    w_dtype = jnp.dtype(compute_dtype)

    w1_t = jnp.zeros((vision_dim, lp), w_dtype).at[:, :latent_dim].set(
        w1.T.astype(w_dtype))
    w2_t = jnp.zeros((lp, lp), w_dtype).at[:latent_dim, :latent_dim].set(
        w2.T.astype(w_dtype))

    def _pad_row(v):
        return jnp.zeros((1, lp), jnp.float32).at[0, :latent_dim].set(
            jnp.asarray(v).astype(jnp.float32))

    return {
        "w1_t": w1_t, "w2_t": w2_t,
        "b2": _pad_row(params["b2"]),
        "gamma": _pad_row(params["gamma"]), "beta": _pad_row(params["beta"]),
        "vision_dim": vision_dim, "latent_dim": latent_dim,
    }


def mlp_resampler(vision_features, prepared, *, eps: float = 1e-5, tile_n=None,
                  out_dtype=None):
    """vision_features: (B, S, vision_dim) or (N, vision_dim) -> same leading shape, latent_dim."""
    orig_shape = vision_features.shape
    x = (vision_features.reshape(-1, orig_shape[-1])
         if vision_features.ndim == 3 else vision_features)

    n, vision_dim = x.shape
    assert vision_dim == prepared["vision_dim"]
    latent_dim = prepared["latent_dim"]
    w1_t, w2_t = prepared["w1_t"], prepared["w2_t"]
    lp = w1_t.shape[1]
    cdt = w1_t.dtype
    out_dtype = jnp.dtype(out_dtype) if out_dtype is not None else vision_features.dtype

    vmem_budget = _vmem_budget_bytes()
    tile = int(tile_n) if tile_n is not None else _pick_tile(
        n, vision_dim, lp, x.dtype.itemsize, cdt.itemsize,
        jnp.dtype(out_dtype).itemsize, vmem_budget)
    grid = (pl.cdiv(n, tile),)

    x_spec = pl.BlockSpec((tile, vision_dim), lambda i: (i, 0))   # K at full extent
    w1_spec = pl.BlockSpec((vision_dim, lp), lambda i: (0, 0))
    w2_spec = pl.BlockSpec((lp, lp), lambda i: (0, 0))
    vec_spec = pl.BlockSpec((1, lp), lambda i: (0, 0))
    row_spec = pl.BlockSpec((tile, lp), lambda i: (i, 0))

    def _cp(sem):
        return pltpu.CompilerParams(dimension_semantics=sem,
                                    vmem_limit_bytes=vmem_budget)

    # ---- pass 1: single x@W1, cache pre-BN h, fused sum / sum-of-squares reduction ----
    h_cache, sum_h, sq_h = pl.pallas_call(
        functools.partial(_stats_kernel, n_valid=n, tile_n=tile),
        out_shape=(jax.ShapeDtypeStruct((n, lp), cdt),
                   jax.ShapeDtypeStruct((1, lp), jnp.float32),
                   jax.ShapeDtypeStruct((1, lp), jnp.float32)),
        grid_spec=pltpu.PrefetchScalarGridSpec(
            num_scalar_prefetch=0, grid=grid,
            in_specs=[x_spec, w1_spec],
            out_specs=(row_spec, vec_spec, vec_spec)),
        compiler_params=_cp(("arbitrary",)),
    )(x, w1_t)

    # BatchNorm batch statistics (training mode, biased variance). b1 cancels exactly.
    inv_n = jnp.float32(1.0 / n)
    mean = sum_h * inv_n
    var = jnp.maximum(sq_h * inv_n - mean * mean, 0.0)
    scale = prepared["gamma"] * jax.lax.rsqrt(var + jnp.float32(eps))
    shift = prepared["beta"] - mean * scale

    # ---- pass 2: folded BN affine + exact GELU + Linear2, row-parallel (megacore) ----
    out_p = pl.pallas_call(
        _apply_kernel,
        out_shape=jax.ShapeDtypeStruct((n, lp), out_dtype),
        grid_spec=pltpu.PrefetchScalarGridSpec(
            num_scalar_prefetch=0, grid=grid,
            in_specs=[row_spec, vec_spec, vec_spec, w2_spec, vec_spec],
            out_specs=row_spec),
        compiler_params=_cp(("parallel",)),
    )(h_cache, scale, shift, w2_t, prepared["b2"])

    out = out_p[:, :latent_dim]
    if vision_features.ndim == 3:
        out = out.reshape(orig_shape[0], orig_shape[1], latent_dim)
    return out


def init_params(key, vision_dim: int, latent_dim: int):
    """Deterministic synthetic init matching the PyTorch module's parameter shapes."""
    k1, k2, k3, k4 = jax.random.split(key, 4)
    lim1 = 1.0 / jnp.sqrt(vision_dim)
    lim2 = 1.0 / jnp.sqrt(latent_dim)
    return {
        "w1": jax.random.uniform(k1, (latent_dim, vision_dim), jnp.float32, -lim1, lim1),
        "b1": jax.random.uniform(k2, (latent_dim,), jnp.float32, -lim1, lim1),
        "gamma": jnp.ones((latent_dim,), jnp.float32),   # BatchNorm1d weight
        "beta": jnp.zeros((latent_dim,), jnp.float32),   # BatchNorm1d bias
        "w2": jax.random.uniform(k3, (latent_dim, latent_dim), jnp.float32, -lim2, lim2),
        "b2": jax.random.uniform(k4, (latent_dim,), jnp.float32, -lim2, lim2),
    }


def _reference(x, params, eps=1e-5):
    """Pure-JAX reference (train-mode BatchNorm batch stats, exact erf GELU)."""
    orig = x.shape
    if x.ndim == 3:
        x = x.reshape(-1, orig[-1])
    h = x @ params["w1"].T + params["b1"]
    mean = h.mean(axis=0, keepdims=True)
    var = ((h - mean) ** 2).mean(axis=0, keepdims=True)
    h = (h - mean) / jnp.sqrt(var + eps) * params["gamma"] + params["beta"]
    h = jax.nn.gelu(h, approximate=False)
    y = h @ params["w2"].T + params["b2"]
    if len(orig) == 3:
        y = y.reshape(orig[0], orig[1], -1)
    return y


if __name__ == "__main__":
    key = jax.random.PRNGKey(0)
    k_in, k_par = jax.random.split(key)

    batch, seq = 2, 8            # (batch, views * patches)
    vision_dim, latent_dim = 32, 32

    vision_features = jax.random.normal(k_in, (batch, seq, vision_dim), jnp.float32)
    params = init_params(k_par, vision_dim, latent_dim)
    ref = _reference(vision_features, params)

    # Default path: bf16 MXU operands, f32 accumulation, f32 BN/GELU epilogue.
    # Tolerance is bf16-level (XLA's default f32 matmul on TPU is itself bf16-based).
    prepared = prepare_params(params)
    out = jax.block_until_ready(mlp_resampler(vision_features, prepared))
    assert out.shape == (batch, seq, latent_dim), out.shape
    assert jnp.allclose(out, ref, atol=1e-1, rtol=1e-1), float(jnp.abs(out - ref).max())

    # f32-weight path: exercises the non-default compute dtype through the same kernels.
    prepared32 = prepare_params(params, compute_dtype=jnp.float32)
    out32 = jax.block_until_ready(mlp_resampler(vision_features, prepared32))
    assert jnp.allclose(out32, ref, atol=1e-1, rtol=1e-1), float(jnp.abs(out32 - ref).max())

    print("KERNEL_OK")
</pallas_src>

<mosaic_0001>
module attributes {stable_mosaic.version = 11 : i64} {
  func.func @_stats_kernel(%arg0: i32, %arg1: memref<16x32xf32, #tpu.memory_space<vmem>>, %arg2: memref<32x128xbf16, #tpu.memory_space<vmem>>, %arg3: memref<16x128xbf16, #tpu.memory_space<vmem>>, %arg4: memref<1x128xf32, #tpu.memory_space<vmem>>, %arg5: memref<1x128xf32, #tpu.memory_space<vmem>>) attributes {dimension_semantics = [#tpu.dimension_semantics<arbitrary>], iteration_bounds = array<i64: 1>, scalar_prefetch = 0 : i64, scratch_operands = 0 : i64, tpu.core_type = #tpu.core_type<tc>, window_params = [{transform_indices = @transform_0, window_bounds = array<i64: 16, 32>}, {pipeline_mode = #tpu.pipeline_mode<synchronous>, transform_indices = @transform_1, window_bounds = array<i64: 32, 128>}, {transform_indices = @transform_2, window_bounds = array<i64: 16, 128>}, {pipeline_mode = #tpu.pipeline_mode<synchronous>, transform_indices = @transform_3, window_bounds = array<i64: 1, 128>}, {pipeline_mode = #tpu.pipeline_mode<synchronous>, transform_indices = @transform_4, window_bounds = array<i64: 1, 128>}]} {
    %c0_i32 = arith.constant 0 : i32
    %0 = arith.cmpi eq, %arg0, %c0_i32 : i32
    %1 = arith.extui %0 : i1 to i32
    %c0_i32_0 = arith.constant 0 : i32
    %2 = arith.cmpi ne, %1, %c0_i32_0 : i32
    scf.if %2 {
      %cst_18 = arith.constant 0.000000e+00 : f32
      %30 = vector.broadcast %cst_18 : f32 to vector<1x128xf32>
      %c0_19 = arith.constant 0 : index
      %c0_20 = arith.constant 0 : index
      %31 = vector.load %arg4[%c0_19, %c0_20] : memref<1x128xf32, #tpu.memory_space<vmem>>, vector<1x128xf32>
      tpu.vector_store %arg4[%c0_19, %c0_20], %30 {strides = array<i32>} : memref<1x128xf32, #tpu.memory_space<vmem>>, vector<1x128xf32>,
      %cst_21 = arith.constant 0.000000e+00 : f32
      %32 = vector.broadcast %cst_21 : f32 to vector<1x128xf32>
      %c0_22 = arith.constant 0 : index
      %c0_23 = arith.constant 0 : index
      %33 = vector.load %arg5[%c0_22, %c0_23] : memref<1x128xf32, #tpu.memory_space<vmem>>, vector<1x128xf32>
      tpu.vector_store %arg5[%c0_22, %c0_23], %32 {strides = array<i32>} : memref<1x128xf32, #tpu.memory_space<vmem>>, vector<1x128xf32>,
    } else {
    }
    %c0 = arith.constant 0 : index
    %c0_1 = arith.constant 0 : index
    %3 = vector.load %arg1[%c0, %c0_1] : memref<16x32xf32, #tpu.memory_space<vmem>>, vector<16x32xf32>
    %4 = arith.truncf %3 : vector<16x32xf32> to vector<16x32xbf16>
    %c0_2 = arith.constant 0 : index
    %c0_3 = arith.constant 0 : index
    %5 = vector.load %arg2[%c0_2, %c0_3] : memref<32x128xbf16, #tpu.memory_space<vmem>>, vector<32x128xbf16>
    %cst = arith.constant dense<0.000000e+00> : vector<16x128xf32>
    %6 = tpu.matmul %4, %5, %cst {dimension_numbers = #tpu.dot_dimension_numbers<[1], [0], [0], [1], [0, 0, 1, 1], [], []>} : vector<16x32xbf16>, vector<32x128xbf16>, vector<16x128xf32> -> vector<16x128xf32>
    %7 = arith.truncf %6 : vector<16x128xf32> to vector<16x128xbf16>
    %c0_4 = arith.constant 0 : index
    %c0_5 = arith.constant 0 : index
    %8 = vector.load %arg3[%c0_4, %c0_5] : memref<16x128xbf16, #tpu.memory_space<vmem>>, vector<16x128xbf16>
    tpu.vector_store %arg3[%c0_4, %c0_5], %7 {strides = array<i32>} : memref<16x128xbf16, #tpu.memory_space<vmem>>, vector<16x128xbf16>,
    %c16_i32 = arith.constant 16 : i32
    %9 = arith.muli %arg0, %c16_i32 : i32
    %10 = tpu.iota {dimensions = array<i32: 0>} : vector<16x1xi32>
    %11 = vector.broadcast %9 : i32 to vector<16x1xi32>
    %12 = arith.addi %11, %10 : vector<16x1xi32>
    %c16_i32_6 = arith.constant 16 : i32
    %13 = vector.broadcast %c16_i32_6 : i32 to vector<16x1xi32>
    %14 = arith.cmpi slt, %12, %13 : vector<16x1xi32>
    %cst_7 = arith.constant 0.000000e+00 : f32
    %15 = vector.shape_cast %14 : vector<16x1xi1> to vector<16x1xi1>
    %16 = vector.broadcast %15 : vector<16x1xi1> to vector<16x128xi1>
    %17 = vector.broadcast %cst_7 : f32 to vector<16x128xf32>
    %18 = arith.select %16, %6, %17 : vector<16x128xi1>, vector<16x128xf32>
    %c0_8 = arith.constant 0 : index
    %c0_9 = arith.constant 0 : index
    %19 = vector.load %arg4[%c0_8, %c0_9] : memref<1x128xf32, #tpu.memory_space<vmem>>, vector<1x128xf32>
    %cst_10 = arith.constant dense<0.000000e+00> : vector<128xf32>
    %20 = vector.multi_reduction <add>, %18, %cst_10 [0] : vector<16x128xf32> to vector<128xf32>
    %21 = vector.shape_cast %20 : vector<128xf32> to vector<1x128xf32>
    %22 = arith.addf %19, %21 : vector<1x128xf32>
    %c0_11 = arith.constant 0 : index
    %c0_12 = arith.constant 0 : index
    %23 = vector.load %arg4[%c0_11, %c0_12] : memref<1x128xf32, #tpu.memory_space<vmem>>, vector<1x128xf32>
    tpu.vector_store %arg4[%c0_11, %c0_12], %22 {strides = array<i32>} : memref<1x128xf32, #tpu.memory_space<vmem>>, vector<1x128xf32>,
    %c0_13 = arith.constant 0 : index
    %c0_14 = arith.constant 0 : index
    %24 = vector.load %arg5[%c0_13, %c0_14] : memref<1x128xf32, #tpu.memory_space<vmem>>, vector<1x128xf32>
    %25 = arith.mulf %18, %18 : vector<16x128xf32>
    %cst_15 = arith.constant dense<0.000000e+00> : vector<128xf32>
    %26 = vector.multi_reduction <add>, %25, %cst_15 [0] : vector<16x128xf32> to vector<128xf32>
    %27 = vector.shape_cast %26 : vector<128xf32> to vector<1x128xf32>
    %28 = arith.addf %24, %27 : vector<1x128xf32>
    %c0_16 = arith.constant 0 : index
    %c0_17 = arith.constant 0 : index
    %29 = vector.load %arg5[%c0_16, %c0_17] : memref<1x128xf32, #tpu.memory_space<vmem>>, vector<1x128xf32>
    tpu.vector_store %arg5[%c0_16, %c0_17], %28 {strides = array<i32>} : memref<1x128xf32, #tpu.memory_space<vmem>>, vector<1x128xf32>,
    return
  }
  func.func @transform_0(%arg0: i32) -> (i32, i32) {
    %c0_i32 = arith.constant 0 : i32
    %c0_i32_0 = arith.constant 0 : i32
    return %arg0, %c0_i32 : i32, i32
  }
  func.func @transform_1(%arg0: i32) -> (i32, i32) {
    %c0_i32 = arith.constant 0 : i32
    %c0_i32_0 = arith.constant 0 : i32
    %c0_i32_1 = arith.constant 0 : i32
    return %c0_i32, %c0_i32_0 : i32, i32
  }
  func.func @transform_2(%arg0: i32) -> (i32, i32) {
    %c0_i32 = arith.constant 0 : i32
    %c0_i32_0 = arith.constant 0 : i32
    return %arg0, %c0_i32 : i32, i32
  }
  func.func @transform_3(%arg0: i32) -> (i32, i32) {
    %c0_i32 = arith.constant 0 : i32
    %c0_i32_0 = arith.constant 0 : i32
    %c0_i32_1 = arith.constant 0 : i32
    return %c0_i32, %c0_i32_0 : i32, i32
  }
  func.func @transform_4(%arg0: i32) -> (i32, i32) {
    %c0_i32 = arith.constant 0 : i32
    %c0_i32_0 = arith.constant 0 : i32
    %c0_i32_1 = arith.constant 0 : i32
    return %c0_i32, %c0_i32_0 : i32, i32
  }
}

</mosaic_0001>

<bundles_post_ra>
// kernel: tpu_custom_call.1
= control target key start
LH: loop header
LB: loop body
LE: loop exit
PB: predicated region body
PF: predicated region fallthrough
CT: control target
= control target key end

     0   :  { %10 = vsyncpa [#allocation3], 0  ;;  %s471_s0 = inlined_call_operand.hbm [shape: f32[16,32], index: 0, kind: input, shape index: {}]   ;;  %s472_s1 = inlined_call_operand.hbm [shape: bf16[32,128], index: 1, kind: input, shape index: {}]   ;;  %s473_s2 = inlined_call_operand.hbm [shape: bf16[16,128], index: 2, kind: output, shape index: {0}]   ;;  %s474_s3 = inlined_call_operand.hbm [shape: f32[1,128], index: 3, kind: output, shape index: {1}]   ;;  %s475_s4 = inlined_call_operand.hbm [shape: f32[1,128], index: 4, kind: output, shape index: {2}]  }
   0x1   :  { %11 = vsyncpa [#allocation6], 0 }
   0x2   :  { %12 = vsyncpa [#allocation4], 0 }
   0x3   :  { %13 = vsyncpa [#allocation9], 0  ;;  %s361_s15 = smov [#allocation2]   ;;  %s243_s19 = scalar_lea.hbm %s471_s0, 256 }
   0x4   :  { %s19_s16 = sshll.u32 %s361_s15, 4  ;;  %p244_p0 = scmp.ne.s32.totalorder %s471_s0, %s243_s19  ;;  %s20_s16 = int_to_ptr.vmem [resolvable:$true] %s19_s16 }
   0x5   :  { %p247_p1 = scmp.lt.u32.totalorder %s243_s19, %s471_s0 }
   0x7   :  { %p249_p2 = pnand %p247_p1, %p244_p0 }
   0x9   :  { %252 = shalt.err (!%p249_p2)
}
   0xa   :  { %s253_s24 = scalar_lea.vmem %s20_s16, 256  ;;  %p258_p4 = scmp.lt.s32.totalorder %s20_s16, %s20_s16 }
   0xb   :  { %p254_p3 = scmp.ne.s32.totalorder %s20_s16, %s253_s24  ;;  %p259_p5 = scmp.lt.s32.totalorder %s253_s24, %s253_s24 }
   0xd   :  { %p260_p6 = por %p259_p5, %p258_p4 }
   0xf   :  { %p261_p7 = pnand %p260_p6, %p254_p3 }
  0x11   :  { %264 = shalt.err (!%p261_p7)
}
  0x12   :  { %s362_s25 = smov 128   ;;  %s363_s26 = smov 8  }
  0x13   :  { %25 = dma.hbm_to_vmem [thread:$0]  %s471_s0, 256, %s20_s16, [#allocation3], %s362_s25, %s362_s25, %s363_s26  }
  0x14   :  { %s364_s29 = smov [#allocation5]   ;;  %s265_s7 = scalar_lea.hbm %s472_s1, 256 }
  0x15   :  { %s31_s30 = sshll.u32 %s364_s29, 4  ;;  %p266_p8 = scmp.ne.s32.totalorder %s472_s1, %s265_s7  ;;  %s32_s30 = int_to_ptr.vmem [resolvable:$true] %s31_s30 }
  0x16   :  { %p269_p9 = scmp.lt.u32.totalorder %s265_s7, %s472_s1 }
  0x18   :  { %p271_p10 = pnand %p269_p9, %p266_p8 }
  0x1a   :  { %274 = shalt.err (!%p271_p10)
}
  0x1b   :  { %s275_s12 = scalar_lea.vmem %s32_s30, 256  ;;  %p280_p12 = scmp.lt.s32.totalorder %s32_s30, %s32_s30 }
  0x1c   :  { %p276_p11 = scmp.ne.s32.totalorder %s32_s30, %s275_s12  ;;  %p281_p13 = scmp.lt.s32.totalorder %s275_s12, %s275_s12 }
  0x1e   :  { %p282_p0 = por %p281_p13, %p280_p12 }
  0x20   :  { %p283_p1 = pnand %p282_p0, %p276_p11 }
  0x22   :  { %286 = shalt.err (!%p283_p1)
}
  0x23   :  { %s365_s0 = smov 64   ;;  %s366_s13 = smov 4  }
  0x24   :  { %37 = dma.hbm_to_vmem [thread:$0]  %s472_s1, 256, %s32_s30, [#allocation6], %s365_s0, %s365_s0, %s366_s13  }
  0x25   :  { %353 = dma.done.wait [#allocation3], 256  }
  0x26   :  { %354 = vsyncadd [#allocation3], 4294967040 }
  0x27   :  { %355 = dma.done.wait [#allocation6], 256  }
  0x28   :  { %356 = vsyncadd [#allocation6], 4294967040  ;;  %v367_v0 = vmov 0.0   ;;  %vm368_vm0 = vmmov 0   ;;  %v241_v1 = vld [vmem:[#allocation5] sm:$0xff]   ;;  %v242_v2 = vld [vmem:[#allocation5 + $0x8] sm:$0xff]  }
  0x29   :  { %222 = vmatprep.subr.bf16.mxu0 %v367_v0  ;;  %49 = vst [vmem:[#allocation8] sm:$0x1] %v367_v0  ;;  %50 = vst [vmem:[#allocation10] sm:$0x1] %v367_v0  ;;  %226 = vmatprep.mubr.msk.bf16.mxu0 %vm368_vm0, %v367_v0  ;;  %v51_v3 = vld [vmem:[#allocation2] sm:$0xff]  ;;  %v52_v4 = vld [vmem:[#allocation2 + $0x8] sm:$0xff] }
  0x2a   :  { %223 = vmatpush3.bf16.msra.mxu0 %v241_v1  ;;  %v53_v5 = vpack.c.bf16 %v52_v4, %v51_v3  ;;  %vm70_vm1 = vcmask 261120   ;;  %s369_s1 = smov [#allocation7]  }
  0x2b   :  { %224 = vmatprep.subr.bf16.mxu0 %v367_v0  ;;  %s167_s16 = sshll.u32 %s369_s1, 4  ;;  %s168_s16 = int_to_ptr.vmem [resolvable:$true] %s167_s16 }
  0x2c   :  { %s287_s17 = scalar_lea.vmem %s168_s16, 128  ;;  %p292_p3 = scmp.lt.s32.totalorder %s168_s16, %s168_s16 }
  0x2d   :  { %p288_p2 = scmp.ne.s32.totalorder %s168_s16, %s287_s17  ;;  %p293_p4 = scmp.lt.s32.totalorder %s287_s17, %s287_s17 }
  0x2e   :  { %225 = vmatpush3.bf16.msra.mxu0 %v242_v2 }
  0x2f   :  { %p294_p5 = por %p293_p4, %p292_p3 }
  0x31   :  { %227 = vmatmul.mubr.msk.bf16.vlgmr.msra.gmra.mrb[0].mxu0 %vm70_vm1, %v53_v5  ;;  %p295_p6 = pnand %p294_p5, %p288_p2 }
 0x104   :  { %v108_v6 = vpop.f32.mrb[0].mxu0 }
 0x105   :  { %v228_v7 = vpop.f32.mrb[1].mxu0  ;;  %v151_v9 = vmul.f32 %v108_v6, %v108_v6 }
 0x106   :  { %v111_v8 = vpop.f32.mrb[2].mxu0 }
 0x107   :  { %v217_v10 = vpack.c.bf16 %v111_v8, %v108_v6  ;;  %v141_v11 = vadd.f32 %v111_v8, %v108_v6  ;;  %v152_v12 = vmul.f32 %v111_v8, %v111_v8  ;;  %v229_v13 = vpop.f32.mrb[3].mxu0 }
 0x109   :  { %v142_v14 = vrot.slane %v141_v11, 4  ;;  %v153_v15 = vadd.f32 %v152_v12, %v151_v9  ;;  %218 = vst [vmem:[#allocation7] sm:$0xff] %v217_v10  }
 0x10a   :  { %298 = shalt.err (!%p295_p6)
}
 0x10b   :  { %s299_s20 = scalar_lea.hbm %s473_s2, 128 }
 0x10c   :  { %p300_p7 = scmp.ne.s32.totalorder %s473_s2, %s299_s20  ;;  %p303_p8 = scmp.lt.u32.totalorder %s299_s20, %s473_s2 }
 0x10e   :  { %p305_p9 = pnand %p303_p8, %p300_p7 }
 0x110   :  { %308 = shalt.err (!%p305_p9)
}
 0x111   :  { %173 = dma.vmem_to_hbm [thread:$0]  %s168_s16, 128, %s473_s2, [#allocation4], %s365_s0, %s365_s0, %s366_s13   ;;  %v143_v16 = vadd.f32 %v142_v14, %v141_v11  ;;  %v154_v17 = vrot.slane %v153_v15, 4  ;;  %v140_v24 = vld [vmem:[#allocation8] sm:$0x1] }
 0x112   :  { %s370_s27 = smov [#allocation8]   ;;  %v150_v27 = vld [vmem:[#allocation10] sm:$0x1]  ;;  %s371_s29 = smov [#allocation10]  }
 0x113   :  { %v144_v18 = vrot.slane %v143_v16, 2  ;;  %v155_v19 = vadd.f32 %v154_v17, %v153_v15  ;;  %s180_s28 = sshll.u32 %s370_s27, 4  ;;  %s190_s30 = sshll.u32 %s371_s29, 4  ;;  %s181_s28 = int_to_ptr.vmem [resolvable:$true] %s180_s28  ;;  %s439_s30 = int_to_ptr.vmem [resolvable:$true] %s190_s30 }
 0x114   :  { %s309_s2 = scalar_lea.vmem %s181_s28, 16  ;;  %s313_s5 = scalar_lea.vmem %s181_s28, 32 }
 0x115   :  { %v145_v20 = vadd.f32 %v144_v18, %v143_v16  ;;  %v156_v21 = vrot.slane %v155_v19, 2  ;;  %p310_p10 = scmp.ne.s32.totalorder %s181_s28, %s309_s2  ;;  %p314_p11 = scmp.lt.s32.totalorder %s181_s28, %s181_s28 }
 0x116   :  { %p315_p12 = scmp.lt.s32.totalorder %s313_s5, %s309_s2 }
 0x117   :  { %v146_v22 = vrot.slane %v145_v20, 1  ;;  %v157_v23 = vadd.f32 %v156_v21, %v155_v19 }
 0x118   :  { %p316_p13 = por %p315_p12, %p314_p11 }
 0x119   :  { %v158_v25 = vrot.slane %v157_v23, 1  ;;  %v147_v26 = vadd.f32 %v146_v22, %v145_v20 }
 0x11a   :  { %p317_p0 = pnand %p316_p13, %p310_p10 }
 0x11b   :  { %v148_v28 = vadd.f32 %v147_v26, %v140_v24  ;;  %v159_v29 = vadd.f32 %v158_v25, %v157_v23 }
 0x11d   :  { %149 = vst [vmem:[#allocation8] sm:$0x1] %v148_v28  ;;  %v160_v30 = vadd.f32 %v159_v29, %v150_v27 }
 0x11e   :  { %320 = shalt.err (!%p317_p0)
}
 0x11f   :  { %s321_s8 = scalar_lea.hbm %s474_s3, 16 }
 0x120   :  { %p322_p1 = scmp.ne.s32.totalorder %s474_s3, %s321_s8  ;;  %p325_p2 = scmp.lt.u32.totalorder %s321_s8, %s474_s3 }
 0x122   :  { %p327_p3 = pnand %p325_p2, %p322_p1 }
 0x124   :  { %330 = shalt.err (!%p327_p3)
}
 0x125   :  { %183 = dma.vmem_to_hbm [thread:$0]  %s181_s28, 16, %s474_s3, [#allocation9]   ;;  %161 = vst [vmem:[#allocation10] sm:$0x1] %v160_v30 }
 0x126   :  { %s331_s14 = scalar_lea.vmem %s439_s30, 16  ;;  %s335_s15 = scalar_lea.vmem %s439_s30, 32 }
 0x127   :  { %p332_p4 = scmp.ne.s32.totalorder %s439_s30, %s331_s14  ;;  %p336_p5 = scmp.lt.s32.totalorder %s439_s30, %s439_s30 }
 0x128   :  { %p337_p6 = scmp.lt.s32.totalorder %s335_s15, %s331_s14 }
 0x12a   :  { %p338_p7 = por %p337_p6, %p336_p5 }
 0x12c   :  { %p339_p8 = pnand %p338_p7, %p332_p4 }
 0x12e   :  { %342 = shalt.err (!%p339_p8)
}
 0x12f   :  { %s343_s17 = scalar_lea.hbm %s475_s4, 16 }
 0x130   :  { %p344_p9 = scmp.ne.s32.totalorder %s475_s4, %s343_s17  ;;  %p347_p10 = scmp.lt.u32.totalorder %s343_s17, %s475_s4 }
 0x132   :  { %p349_p11 = pnand %p347_p10, %p344_p9 }
 0x134   :  { %352 = shalt.err (!%p349_p11)
}
 0x135   :  { %193 = dma.vmem_to_hbm [thread:$0]  %s439_s30, 16, %s475_s4, [#allocation9]  }
 0x136   :  { %357 = dma.done.wait [#allocation4], 128  }
 0x137   :  { %358 = vsyncadd [#allocation4], 4294967168 }
 0x138   :  { %359 = dma.done.wait [#allocation9], 32  }
 0x139   :  { %360 = vsyncadd [#allocation9], 4294967264 }
 0x13a   :  { %203 = vsyncpa [#allocation3], 1 }
 0x13b   :  { %204 = vsyncpa [#allocation6], 1 }
 0x13c   :  { %205 = vsyncpa [#allocation4], 1 }
 0x13d   :  { %206 = vsyncpa [#allocation9], 1 }

</bundles_post_ra>
